<compile_context>
chip_gen: v5e
topology: v5e:2x2
jax: 0.10.0
libtpu: 0.0.40
codegen_flags: <defaults>
</compile_context>

<pallas_src>
import functools

import jax
import jax.numpy as jnp
from jax.experimental import pallas as pl
from jax.experimental.pallas import tpu as pltpu

BN_EPS = 1e-5
LRELU_SLOPE = 0.2
C_PAD = 128           # lane-dense padded width for weights / BN params (MXU output lanes)
MAX_TILE_M = 1024     # row tile for the large-M (two-kernel) path
FUSE_MAX_M = 1024     # whole block fused into one pallas_call when M <= this
VMEM_LIMIT = 32 * 1024 * 1024


def _round_up(x, m):
    return (x + m - 1) // m * m


# ---------------------------------------------------------------------------
# Shared BN helper: bias-free stats -> scale/shift (bias folded into the mean)
# ---------------------------------------------------------------------------
def _bn_scale_shift(convnb, bias, gamma, beta, inv_m):
    s = jnp.sum(convnb, axis=0, keepdims=True) * inv_m          # (1, C) bias-free mean
    ss = jnp.sum(convnb * convnb, axis=0, keepdims=True) * inv_m
    mean = s + bias                                             # fold bias into the mean
    var = jnp.maximum(ss - s * s, 0.0)                          # bias-invariant variance
    scale = gamma * jax.lax.rsqrt(var + BN_EPS)
    shift = beta - mean * scale
    return scale, shift


# ---------------------------------------------------------------------------
# Fused whole-block kernels (single tile, grid=(1,)):
#   conv matmul + bias + BN stats + BN finalize + LeakyReLU (+ 1x1 classifier)
# ---------------------------------------------------------------------------
def _fused_block_kernel(inv_m, cout, a_ref, w_ref, b_ref, g_ref, be_ref,
                        conv_ref, bn_ref, act_ref):
    convnb = jnp.dot(a_ref[...], w_ref[...], preferred_element_type=jnp.float32)
    bias = b_ref[...]
    conv = convnb + bias
    conv_ref[...] = conv[:, :cout]
    scale, shift = _bn_scale_shift(convnb, bias, g_ref[...], be_ref[...], inv_m)
    bn = conv * scale + shift
    bn_ref[...] = bn[:, :cout]
    act = jnp.where(bn >= 0, bn, LRELU_SLOPE * bn)
    act_ref[...] = act[:, :cout]


def _fused_block_cls_kernel(inv_m, cout, a_ref, w_ref, b_ref, g_ref, be_ref,
                            wcl_ref, bcl_ref, conv_ref, bn_ref, act_ref, cls_ref):
    convnb = jnp.dot(a_ref[...], w_ref[...], preferred_element_type=jnp.float32)
    bias = b_ref[...]
    conv = convnb + bias
    conv_ref[...] = conv[:, :cout]
    scale, shift = _bn_scale_shift(convnb, bias, g_ref[...], be_ref[...], inv_m)
    bn = conv * scale + shift
    bn_ref[...] = bn[:, :cout]
    act = jnp.where(bn >= 0, bn, LRELU_SLOPE * bn)
    act_ref[...] = act[:, :cout]
    # 1x1 classifier: VPU multiply + XLU lane reduction; padded lanes carry zero weight.
    cls_ref[...] = jnp.sum(act * wcl_ref[...], axis=-1, keepdims=True) + bcl_ref[...]


def fused_block(patches_bf16, w2p, bias_p, gamma_p, beta_p, cout, m_valid,
                classifier=None):
    Mp, K = patches_bf16.shape
    inv_m = 1.0 / float(m_valid)
    z2 = lambda i: (0, 0)
    in_specs = [
        pl.BlockSpec((Mp, K), z2),
        pl.BlockSpec((K, C_PAD), z2),
        pl.BlockSpec((1, C_PAD), z2),
        pl.BlockSpec((1, C_PAD), z2),
        pl.BlockSpec((1, C_PAD), z2),
    ]
    out_specs = [pl.BlockSpec((Mp, cout), z2)] * 3
    out_shape = [jax.ShapeDtypeStruct((Mp, cout), jnp.float32)] * 3
    args = [patches_bf16, w2p, bias_p, gamma_p, beta_p]
    if classifier is None:
        kern = functools.partial(_fused_block_kernel, inv_m, cout)
    else:
        wcl_p, bcl = classifier
        kern = functools.partial(_fused_block_cls_kernel, inv_m, cout)
        in_specs += [pl.BlockSpec((1, C_PAD), z2), pl.BlockSpec((1, 1), z2)]
        out_specs = out_specs + [pl.BlockSpec((Mp, 1), z2)]
        out_shape = out_shape + [jax.ShapeDtypeStruct((Mp, 1), jnp.float32)]
        args += [wcl_p, bcl]
    return pl.pallas_call(
        kern,
        grid=(1,),
        in_specs=in_specs,
        out_specs=tuple(out_specs),
        out_shape=tuple(out_shape),
        compiler_params=pltpu.CompilerParams(
            dimension_semantics=("arbitrary",),
            vmem_limit_bytes=VMEM_LIMIT,
        ),
    )(*args)


# ---------------------------------------------------------------------------
# Large-M path kernel 1: tiled conv-as-matmul (+bias) with bias-free per-tile stats
# ---------------------------------------------------------------------------
def _conv_stats_kernel(cout, a_ref, w_ref, b_ref, conv_ref, s_ref, ss_ref):
    convnb = jnp.dot(a_ref[...], w_ref[...], preferred_element_type=jnp.float32)
    conv_ref[...] = (convnb + b_ref[...])[:, :cout]
    # Bias-free partial stats (zero-padded rows of the last tile contribute exactly 0).
    s_ref[...] = jnp.sum(convnb, axis=0, keepdims=True)
    ss_ref[...] = jnp.sum(convnb * convnb, axis=0, keepdims=True)


def conv_stats(patches_bf16, w2p, bias_p, cout, tile_m):
    Mp, K = patches_bf16.shape
    n_tiles = Mp // tile_m
    return pl.pallas_call(
        functools.partial(_conv_stats_kernel, cout),
        grid=(n_tiles,),
        in_specs=[
            pl.BlockSpec((tile_m, K), lambda i: (i, 0)),
            pl.BlockSpec((K, C_PAD), lambda i: (0, 0)),
            pl.BlockSpec((1, C_PAD), lambda i: (0, 0)),
        ],
        out_specs=(
            pl.BlockSpec((tile_m, cout), lambda i: (i, 0)),
            pl.BlockSpec((1, C_PAD), lambda i: (i, 0)),
            pl.BlockSpec((1, C_PAD), lambda i: (i, 0)),
        ),
        out_shape=(
            jax.ShapeDtypeStruct((Mp, cout), jnp.float32),
            jax.ShapeDtypeStruct((n_tiles, C_PAD), jnp.float32),
            jax.ShapeDtypeStruct((n_tiles, C_PAD), jnp.float32),
        ),
        compiler_params=pltpu.CompilerParams(
            dimension_semantics=("parallel",),
            vmem_limit_bytes=VMEM_LIMIT,
        ),
    )(patches_bf16, w2p, bias_p)


def _finalize_bn_params(s_parts, ss_parts, bias_p, gamma_p, beta_p, m_valid, cout):
    # Tiny (n_tiles, 128) reductions; PyTorch training-mode BN: batch mean, biased
    # variance, eps=1e-5, gamma/beta folded into scale/shift; conv bias folded into mean.
    s = jnp.sum(s_parts, axis=0, keepdims=True) / m_valid
    ss = jnp.sum(ss_parts, axis=0, keepdims=True) / m_valid
    mean = s + bias_p
    var = jnp.maximum(ss - s * s, 0.0)
    scale = gamma_p * jax.lax.rsqrt(var + BN_EPS)
    shift = beta_p - mean * scale
    return scale[:, :cout], shift[:, :cout]


# ---------------------------------------------------------------------------
# Large-M path kernel 2: fused BatchNorm apply + LeakyReLU (+ optional 1x1 classifier)
# ---------------------------------------------------------------------------
def _bn_act_kernel(conv_ref, scale_ref, shift_ref, bn_ref, act_ref):
    y = conv_ref[...] * scale_ref[...] + shift_ref[...]
    bn_ref[...] = y
    act_ref[...] = jnp.where(y >= 0, y, LRELU_SLOPE * y)


def _bn_act_cls_kernel(conv_ref, scale_ref, shift_ref, wcl_ref, bcl_ref,
                       bn_ref, act_ref, cls_ref):
    y = conv_ref[...] * scale_ref[...] + shift_ref[...]
    bn_ref[...] = y
    act = jnp.where(y >= 0, y, LRELU_SLOPE * y)
    act_ref[...] = act
    cls_ref[...] = jnp.sum(act * wcl_ref[...], axis=-1, keepdims=True) + bcl_ref[...]


def bn_act(conv_r, scale, shift, tile_m, classifier=None):
    Mp, cout = conv_r.shape
    n_tiles = Mp // tile_m
    in_specs = [
        pl.BlockSpec((tile_m, cout), lambda i: (i, 0)),
        pl.BlockSpec((1, cout), lambda i: (0, 0)),
        pl.BlockSpec((1, cout), lambda i: (0, 0)),
    ]
    out_specs = [pl.BlockSpec((tile_m, cout), lambda i: (i, 0))] * 2
    out_shape = [jax.ShapeDtypeStruct((Mp, cout), jnp.float32)] * 2
    args = [conv_r, scale, shift]
    if classifier is None:
        kern = _bn_act_kernel
    else:
        wcl, bcl = classifier
        kern = _bn_act_cls_kernel
        in_specs += [pl.BlockSpec((1, cout), lambda i: (0, 0)),
                     pl.BlockSpec((1, 1), lambda i: (0, 0))]
        out_specs = out_specs + [pl.BlockSpec((tile_m, 1), lambda i: (i, 0))]
        out_shape = out_shape + [jax.ShapeDtypeStruct((Mp, 1), jnp.float32)]
        args += [wcl, bcl]
    return pl.pallas_call(
        kern,
        grid=(n_tiles,),
        in_specs=in_specs,
        out_specs=tuple(out_specs),
        out_shape=tuple(out_shape),
        compiler_params=pltpu.CompilerParams(
            dimension_semantics=("parallel",),
            vmem_limit_bytes=VMEM_LIMIT,
        ),
    )(*args)


# ---------------------------------------------------------------------------
# JAX glue: im2col patch extraction (data movement only; matmul is in Pallas)
# ---------------------------------------------------------------------------
def im2col(x_nhwc, ksize, stride, pad):
    N, H, W, C = x_nhwc.shape
    xp = jnp.pad(x_nhwc, ((0, 0), (pad, pad), (pad, pad), (0, 0)))
    Hp, Wp = H + 2 * pad, W + 2 * pad
    Ho = (Hp - ksize) // stride + 1
    Wo = (Wp - ksize) // stride + 1
    taps = []
    for kh in range(ksize):
        for kw in range(ksize):
            taps.append(
                xp[:, kh:kh + Ho * stride:stride, kw:kw + Wo * stride:stride, :]
            )
    p = jnp.stack(taps, axis=3)  # (N, Ho, Wo, K*K, C): tap-major, channel-minor
    return p.reshape(N * Ho * Wo, ksize * ksize * C), Ho, Wo


# ---------------------------------------------------------------------------
# Model
# ---------------------------------------------------------------------------
def init_params(key):
    """arch = 'I3,C4-32-2,C4-64-2', classifier Conv2d(64, 1, 1).

    Weights are stored kernel-ready: conv weights reshaped to (K*K*Cin, 128) bf16
    (channels zero-padded to 128 lanes), bias/gamma/beta/classifier padded to 128.
    """
    ks = jax.random.split(key, 6)
    blocks = []
    dims = [(3, 32), (32, 64)]
    for i, (cin, cout) in enumerate(dims):
        w = 0.05 * jax.random.normal(ks[2 * i], (cout, cin, 4, 4), jnp.float32)
        b = 0.05 * jax.random.normal(ks[2 * i + 1], (cout,), jnp.float32)
        # (Cout, Cin, K, K) -> (K, K, Cin, Cout) -> (K*K*Cin, Cout): matches im2col order.
        w2 = jnp.transpose(w, (2, 3, 1, 0)).reshape(-1, cout)
        K = w2.shape[0]
        w2p = jnp.zeros((K, C_PAD), jnp.float32).at[:, :cout].set(w2).astype(jnp.bfloat16)
        bias_p = jnp.zeros((1, C_PAD), jnp.float32).at[0, :cout].set(b)
        gamma_p = jnp.zeros((1, C_PAD), jnp.float32).at[0, :cout].set(1.0)  # BN gamma=1
        beta_p = jnp.zeros((1, C_PAD), jnp.float32)                         # BN beta=0
        blocks.append((w2p, bias_p, gamma_p, beta_p, cout))
    wcl = 0.05 * jax.random.normal(ks[4], (1, 64, 1, 1), jnp.float32)
    bcl = 0.05 * jax.random.normal(ks[5], (1,), jnp.float32)
    wcl_p = jnp.zeros((1, C_PAD), jnp.float32).at[0, :64].set(wcl.reshape(64))
    return {"blocks": blocks, "classifier": (wcl_p, bcl.reshape(1, 1))}


def patch_discriminator_feature(x_nchw, params, layout=None):
    if layout is not None:
        x_nchw = jnp.concatenate([x_nchw, layout], axis=1)
    # NCHW -> NHWC; cast to bf16 BEFORE im2col so the materialized patch buffer is half
    # the bytes (MXU runs bf16 inputs with f32 accumulation).
    x = jnp.transpose(x_nchw, (0, 2, 3, 1)).astype(jnp.bfloat16)
    features = []                            # one entry per nn.Module child, NCHW
    n_blocks = len(params["blocks"])
    classifier = params["classifier"]
    out = None

    for bi, (w2p, bias_p, gamma_p, beta_p, cout) in enumerate(params["blocks"]):
        is_last = bi == n_blocks - 1
        N = x.shape[0]
        patches, Ho, Wo = im2col(x, ksize=4, stride=2, pad=1)
        M = N * Ho * Wo

        cls2d = None
        if M <= FUSE_MAX_M:
            # Small/medium M: the whole block in ONE pallas_call, conv kept in VMEM.
            Mp = _round_up(M, 16)            # bf16 sublane packing
            if Mp != M:
                patches = jnp.pad(patches, ((0, Mp - M), (0, 0)))
            outs = fused_block(patches, w2p, bias_p, gamma_p, beta_p, cout, M,
                               classifier=classifier if is_last else None)
            if is_last:
                conv_r, bn_r, act_r, cls2d = outs
            else:
                conv_r, bn_r, act_r = outs
        else:
            # Large M: tiled conv+stats pass, tiny finalize, tiled BN+act pass.
            # Guarantee >= 2 tiles so the "parallel" axis shards across v7x's 2 TCs.
            tile_m = min(MAX_TILE_M, _round_up((M + 1) // 2, 16))
            Mp = _round_up(M, tile_m)
            if Mp != M:
                patches = jnp.pad(patches, ((0, Mp - M), (0, 0)))
            conv_r, s_parts, ss_parts = conv_stats(patches, w2p, bias_p, cout, tile_m)
            scale, shift = _finalize_bn_params(s_parts, ss_parts, bias_p, gamma_p,
                                               beta_p, float(M), cout)
            if is_last:
                wcl_p, bcl = classifier
                bn_r, act_r, cls2d = bn_act(conv_r, scale, shift, tile_m,
                                            classifier=(wcl_p[:, :cout], bcl))
            else:
                bn_r, act_r = bn_act(conv_r, scale, shift, tile_m)

        # TODO(synk): emit NCHW features (and the bf16 next-block input) directly from the
        # kernels (in-kernel XLU transpose + 3-D out BlockSpec) to drop these XLA passes.
        def to_nchw(a2d, c):
            return jnp.transpose(a2d[:M].reshape(N, Ho, Wo, c), (0, 3, 1, 2))

        features.append(to_nchw(conv_r, cout))
        features.append(to_nchw(bn_r, cout))
        features.append(to_nchw(act_r, cout))
        if is_last:
            out = to_nchw(cls2d, 1)
        x = act_r[:M].reshape(N, Ho, Wo, cout).astype(jnp.bfloat16)

    return out, features


if __name__ == "__main__":
    key = jax.random.PRNGKey(0)
    k_param, k_x = jax.random.split(key)
    params = init_params(k_param)

    # input_dim = 3 + layout_dim (layout_dim = 0)
    x = jax.random.normal(k_x, (2, 3, 16, 16), jnp.float32)

    fwd = jax.jit(lambda x: patch_discriminator_feature(x, params))
    out, feats = fwd(x)
    jax.block_until_ready(out)
    for f in feats:
        jax.block_until_ready(f)

    assert out.shape == (2, 1, 4, 4), out.shape
    expected_feat_shapes = [
        (2, 32, 8, 8), (2, 32, 8, 8), (2, 32, 8, 8),
        (2, 64, 4, 4), (2, 64, 4, 4), (2, 64, 4, 4),
    ]
    assert [tuple(f.shape) for f in feats] == expected_feat_shapes
    print("KERNEL_OK")
</pallas_src>

<mosaic_0001>
module attributes {stable_mosaic.version = 11 : i64} {
  func.func @_fused_block_kernel(%arg0: i32, %arg1: memref<128x48xbf16, #tpu.memory_space<vmem>>, %arg2: memref<48x128xbf16, #tpu.memory_space<vmem>>, %arg3: memref<1x128xf32, #tpu.memory_space<vmem>>, %arg4: memref<1x128xf32, #tpu.memory_space<vmem>>, %arg5: memref<1x128xf32, #tpu.memory_space<vmem>>, %arg6: memref<128x32xf32, #tpu.memory_space<vmem>>, %arg7: memref<128x32xf32, #tpu.memory_space<vmem>>, %arg8: memref<128x32xf32, #tpu.memory_space<vmem>>) attributes {dimension_semantics = [#tpu.dimension_semantics<arbitrary>], iteration_bounds = array<i64: 1>, scalar_prefetch = 0 : i64, scratch_operands = 0 : i64, tpu.core_type = #tpu.core_type<tc>, window_params = [{pipeline_mode = #tpu.pipeline_mode<synchronous>, transform_indices = @transform_0, window_bounds = array<i64: 128, 48>}, {pipeline_mode = #tpu.pipeline_mode<synchronous>, transform_indices = @transform_1, window_bounds = array<i64: 48, 128>}, {pipeline_mode = #tpu.pipeline_mode<synchronous>, transform_indices = @transform_2, window_bounds = array<i64: 1, 128>}, {pipeline_mode = #tpu.pipeline_mode<synchronous>, transform_indices = @transform_3, window_bounds = array<i64: 1, 128>}, {pipeline_mode = #tpu.pipeline_mode<synchronous>, transform_indices = @transform_4, window_bounds = array<i64: 1, 128>}, {pipeline_mode = #tpu.pipeline_mode<synchronous>, transform_indices = @transform_5, window_bounds = array<i64: 128, 32>}, {pipeline_mode = #tpu.pipeline_mode<synchronous>, transform_indices = @transform_6, window_bounds = array<i64: 128, 32>}, {pipeline_mode = #tpu.pipeline_mode<synchronous>, transform_indices = @transform_7, window_bounds = array<i64: 128, 32>}]} {
    %c0 = arith.constant 0 : index
    %c0_0 = arith.constant 0 : index
    %0 = vector.load %arg1[%c0, %c0_0] : memref<128x48xbf16, #tpu.memory_space<vmem>>, vector<128x48xbf16>
    %c0_1 = arith.constant 0 : index
    %c0_2 = arith.constant 0 : index
    %1 = vector.load %arg2[%c0_1, %c0_2] : memref<48x128xbf16, #tpu.memory_space<vmem>>, vector<48x128xbf16>
    %cst = arith.constant dense<0.000000e+00> : vector<128x128xf32>
    %2 = tpu.matmul %0, %1, %cst {dimension_numbers = #tpu.dot_dimension_numbers<[1], [0], [0], [1], [0, 0, 1, 1], [], []>} : vector<128x48xbf16>, vector<48x128xbf16>, vector<128x128xf32> -> vector<128x128xf32>
    %c0_3 = arith.constant 0 : index
    %c0_4 = arith.constant 0 : index
    %3 = vector.load %arg3[%c0_3, %c0_4] : memref<1x128xf32, #tpu.memory_space<vmem>>, vector<1x128xf32>
    %4 = vector.broadcast %3 : vector<1x128xf32> to vector<128x128xf32>
    %5 = arith.addf %2, %4 : vector<128x128xf32>
    %6 = vector.extract_strided_slice %5 {offsets = [0, 0], sizes = [128, 32], strides = [1, 1]} : vector<128x128xf32> to vector<128x32xf32>
    %c0_5 = arith.constant 0 : index
    %c0_6 = arith.constant 0 : index
    %7 = vector.load %arg6[%c0_5, %c0_6] : memref<128x32xf32, #tpu.memory_space<vmem>>, vector<128x32xf32>
    tpu.vector_store %arg6[%c0_5, %c0_6], %6 {strides = array<i32>} : memref<128x32xf32, #tpu.memory_space<vmem>>, vector<128x32xf32>,
    %c0_7 = arith.constant 0 : index
    %c0_8 = arith.constant 0 : index
    %8 = vector.load %arg4[%c0_7, %c0_8] : memref<1x128xf32, #tpu.memory_space<vmem>>, vector<1x128xf32>
    %c0_9 = arith.constant 0 : index
    %c0_10 = arith.constant 0 : index
    %9 = vector.load %arg5[%c0_9, %c0_10] : memref<1x128xf32, #tpu.memory_space<vmem>>, vector<1x128xf32>
    %cst_11 = arith.constant dense<0.000000e+00> : vector<128xf32>
    %10 = vector.multi_reduction <add>, %2, %cst_11 [0] : vector<128x128xf32> to vector<128xf32>
    %11 = vector.shape_cast %10 : vector<128xf32> to vector<1x128xf32>
    %cst_12 = arith.constant 7.812500e-03 : f32
    %12 = vector.broadcast %cst_12 : f32 to vector<1x128xf32>
    %13 = arith.mulf %11, %12 : vector<1x128xf32>
    %14 = arith.mulf %2, %2 : vector<128x128xf32>
    %cst_13 = arith.constant dense<0.000000e+00> : vector<128xf32>
    %15 = vector.multi_reduction <add>, %14, %cst_13 [0] : vector<128x128xf32> to vector<128xf32>
    %16 = vector.shape_cast %15 : vector<128xf32> to vector<1x128xf32>
    %cst_14 = arith.constant 7.812500e-03 : f32
    %17 = vector.broadcast %cst_14 : f32 to vector<1x128xf32>
    %18 = arith.mulf %16, %17 : vector<1x128xf32>
    %19 = arith.addf %13, %3 : vector<1x128xf32>
    %20 = arith.mulf %13, %13 : vector<1x128xf32>
    %21 = arith.subf %18, %20 : vector<1x128xf32>
    %cst_15 = arith.constant 0.000000e+00 : f32
    %22 = vector.broadcast %cst_15 : f32 to vector<1x128xf32>
    %23 = arith.maximumf %21, %22 : vector<1x128xf32>
    %cst_16 = arith.constant 9.99999974E-6 : f32
    %24 = vector.broadcast %cst_16 : f32 to vector<1x128xf32>
    %25 = arith.addf %23, %24 : vector<1x128xf32>
    %26 = math.rsqrt %25 : vector<1x128xf32>
    %27 = arith.mulf %8, %26 : vector<1x128xf32>
    %28 = arith.mulf %19, %27 : vector<1x128xf32>
    %29 = arith.subf %9, %28 : vector<1x128xf32>
    %30 = vector.broadcast %27 : vector<1x128xf32> to vector<128x128xf32>
    %31 = arith.mulf %5, %30 : vector<128x128xf32>
    %32 = vector.broadcast %29 : vector<1x128xf32> to vector<128x128xf32>
    %33 = arith.addf %31, %32 : vector<128x128xf32>
    %34 = vector.extract_strided_slice %33 {offsets = [0, 0], sizes = [128, 32], strides = [1, 1]} : vector<128x128xf32> to vector<128x32xf32>
    %c0_17 = arith.constant 0 : index
    %c0_18 = arith.constant 0 : index
    %35 = vector.load %arg7[%c0_17, %c0_18] : memref<128x32xf32, #tpu.memory_space<vmem>>, vector<128x32xf32>
    tpu.vector_store %arg7[%c0_17, %c0_18], %34 {strides = array<i32>} : memref<128x32xf32, #tpu.memory_space<vmem>>, vector<128x32xf32>,
    %cst_19 = arith.constant 0.000000e+00 : f32
    %36 = vector.broadcast %cst_19 : f32 to vector<128x128xf32>
    %37 = arith.cmpf oge, %33, %36 : vector<128x128xf32>
    %cst_20 = arith.constant 2.000000e-01 : f32
    %38 = vector.broadcast %cst_20 : f32 to vector<128x128xf32>
    %39 = arith.mulf %38, %33 : vector<128x128xf32>
    %40 = arith.select %37, %33, %39 : vector<128x128xi1>, vector<128x128xf32>
    %41 = vector.extract_strided_slice %40 {offsets = [0, 0], sizes = [128, 32], strides = [1, 1]} : vector<128x128xf32> to vector<128x32xf32>
    %c0_21 = arith.constant 0 : index
    %c0_22 = arith.constant 0 : index
    %42 = vector.load %arg8[%c0_21, %c0_22] : memref<128x32xf32, #tpu.memory_space<vmem>>, vector<128x32xf32>
    tpu.vector_store %arg8[%c0_21, %c0_22], %41 {strides = array<i32>} : memref<128x32xf32, #tpu.memory_space<vmem>>, vector<128x32xf32>,
    return
  }
  func.func @transform_0(%arg0: i32) -> (i32, i32) {
    %c0_i32 = arith.constant 0 : i32
    %c0_i32_0 = arith.constant 0 : i32
    %c0_i32_1 = arith.constant 0 : i32
    return %c0_i32, %c0_i32_0 : i32, i32
  }
  func.func @transform_1(%arg0: i32) -> (i32, i32) {
    %c0_i32 = arith.constant 0 : i32
    %c0_i32_0 = arith.constant 0 : i32
    %c0_i32_1 = arith.constant 0 : i32
    return %c0_i32, %c0_i32_0 : i32, i32
  }
  func.func @transform_2(%arg0: i32) -> (i32, i32) {
    %c0_i32 = arith.constant 0 : i32
    %c0_i32_0 = arith.constant 0 : i32
    %c0_i32_1 = arith.constant 0 : i32
    return %c0_i32, %c0_i32_0 : i32, i32
  }
  func.func @transform_3(%arg0: i32) -> (i32, i32) {
    %c0_i32 = arith.constant 0 : i32
    %c0_i32_0 = arith.constant 0 : i32
    %c0_i32_1 = arith.constant 0 : i32
    return %c0_i32, %c0_i32_0 : i32, i32
  }
  func.func @transform_4(%arg0: i32) -> (i32, i32) {
    %c0_i32 = arith.constant 0 : i32
    %c0_i32_0 = arith.constant 0 : i32
    %c0_i32_1 = arith.constant 0 : i32
    return %c0_i32, %c0_i32_0 : i32, i32
  }
  func.func @transform_5(%arg0: i32) -> (i32, i32) {
    %c0_i32 = arith.constant 0 : i32
    %c0_i32_0 = arith.constant 0 : i32
    %c0_i32_1 = arith.constant 0 : i32
    return %c0_i32, %c0_i32_0 : i32, i32
  }
  func.func @transform_6(%arg0: i32) -> (i32, i32) {
    %c0_i32 = arith.constant 0 : i32
    %c0_i32_0 = arith.constant 0 : i32
    %c0_i32_1 = arith.constant 0 : i32
    return %c0_i32, %c0_i32_0 : i32, i32
  }
  func.func @transform_7(%arg0: i32) -> (i32, i32) {
    %c0_i32 = arith.constant 0 : i32
    %c0_i32_0 = arith.constant 0 : i32
    %c0_i32_1 = arith.constant 0 : i32
    return %c0_i32, %c0_i32_0 : i32, i32
  }
}

module attributes {stable_mosaic.version = 11 : i64} {
  func.func @_fused_block_cls_kernel(%arg0: i32, %arg1: memref<32x512xbf16, #tpu.memory_space<vmem>>, %arg2: memref<512x128xbf16, #tpu.memory_space<vmem>>, %arg3: memref<1x128xf32, #tpu.memory_space<vmem>>, %arg4: memref<1x128xf32, #tpu.memory_space<vmem>>, %arg5: memref<1x128xf32, #tpu.memory_space<vmem>>, %arg6: memref<1x128xf32, #tpu.memory_space<vmem>>, %arg7: memref<1x1xf32, #tpu.memory_space<vmem>>, %arg8: memref<32x64xf32, #tpu.memory_space<vmem>>, %arg9: memref<32x64xf32, #tpu.memory_space<vmem>>, %arg10: memref<32x64xf32, #tpu.memory_space<vmem>>, %arg11: memref<32x1xf32, #tpu.memory_space<vmem>>) attributes {dimension_semantics = [#tpu.dimension_semantics<arbitrary>], iteration_bounds = array<i64: 1>, scalar_prefetch = 0 : i64, scratch_operands = 0 : i64, tpu.core_type = #tpu.core_type<tc>, window_params = [{pipeline_mode = #tpu.pipeline_mode<synchronous>, transform_indices = @transform_0, window_bounds = array<i64: 32, 512>}, {pipeline_mode = #tpu.pipeline_mode<synchronous>, transform_indices = @transform_1, window_bounds = array<i64: 512, 128>}, {pipeline_mode = #tpu.pipeline_mode<synchronous>, transform_indices = @transform_2, window_bounds = array<i64: 1, 128>}, {pipeline_mode = #tpu.pipeline_mode<synchronous>, transform_indices = @transform_3, window_bounds = array<i64: 1, 128>}, {pipeline_mode = #tpu.pipeline_mode<synchronous>, transform_indices = @transform_4, window_bounds = array<i64: 1, 128>}, {pipeline_mode = #tpu.pipeline_mode<synchronous>, transform_indices = @transform_5, window_bounds = array<i64: 1, 128>}, {pipeline_mode = #tpu.pipeline_mode<synchronous>, transform_indices = @transform_6, window_bounds = array<i64: 1, 1>}, {pipeline_mode = #tpu.pipeline_mode<synchronous>, transform_indices = @transform_7, window_bounds = array<i64: 32, 64>}, {pipeline_mode = #tpu.pipeline_mode<synchronous>, transform_indices = @transform_8, window_bounds = array<i64: 32, 64>}, {pipeline_mode = #tpu.pipeline_mode<synchronous>, transform_indices = @transform_9, window_bounds = array<i64: 32, 64>}, {pipeline_mode = #tpu.pipeline_mode<synchronous>, transform_indices = @transform_10, window_bounds = array<i64: 32, 1>}]} {
    %c0 = arith.constant 0 : index
    %c0_0 = arith.constant 0 : index
    %0 = vector.load %arg1[%c0, %c0_0] : memref<32x512xbf16, #tpu.memory_space<vmem>>, vector<32x512xbf16>
    %c0_1 = arith.constant 0 : index
    %c0_2 = arith.constant 0 : index
    %1 = vector.load %arg2[%c0_1, %c0_2] : memref<512x128xbf16, #tpu.memory_space<vmem>>, vector<512x128xbf16>
    %cst = arith.constant dense<0.000000e+00> : vector<32x128xf32>
    %2 = tpu.matmul %0, %1, %cst {dimension_numbers = #tpu.dot_dimension_numbers<[1], [0], [0], [1], [0, 0, 1, 1], [], []>} : vector<32x512xbf16>, vector<512x128xbf16>, vector<32x128xf32> -> vector<32x128xf32>
    %c0_3 = arith.constant 0 : index
    %c0_4 = arith.constant 0 : index
    %3 = vector.load %arg3[%c0_3, %c0_4] : memref<1x128xf32, #tpu.memory_space<vmem>>, vector<1x128xf32>
    %4 = vector.broadcast %3 : vector<1x128xf32> to vector<32x128xf32>
    %5 = arith.addf %2, %4 : vector<32x128xf32>
    %6 = vector.extract_strided_slice %5 {offsets = [0, 0], sizes = [32, 64], strides = [1, 1]} : vector<32x128xf32> to vector<32x64xf32>
    %c0_5 = arith.constant 0 : index
    %c0_6 = arith.constant 0 : index
    %7 = vector.load %arg8[%c0_5, %c0_6] : memref<32x64xf32, #tpu.memory_space<vmem>>, vector<32x64xf32>
    tpu.vector_store %arg8[%c0_5, %c0_6], %6 {strides = array<i32>} : memref<32x64xf32, #tpu.memory_space<vmem>>, vector<32x64xf32>,
    %c0_7 = arith.constant 0 : index
    %c0_8 = arith.constant 0 : index
    %8 = vector.load %arg4[%c0_7, %c0_8] : memref<1x128xf32, #tpu.memory_space<vmem>>, vector<1x128xf32>
    %c0_9 = arith.constant 0 : index
    %c0_10 = arith.constant 0 : index
    %9 = vector.load %arg5[%c0_9, %c0_10] : memref<1x128xf32, #tpu.memory_space<vmem>>, vector<1x128xf32>
    %cst_11 = arith.constant dense<0.000000e+00> : vector<128xf32>
    %10 = vector.multi_reduction <add>, %2, %cst_11 [0] : vector<32x128xf32> to vector<128xf32>
    %11 = vector.shape_cast %10 : vector<128xf32> to vector<1x128xf32>
    %cst_12 = arith.constant 3.125000e-02 : f32
    %12 = vector.broadcast %cst_12 : f32 to vector<1x128xf32>
    %13 = arith.mulf %11, %12 : vector<1x128xf32>
    %14 = arith.mulf %2, %2 : vector<32x128xf32>
    %cst_13 = arith.constant dense<0.000000e+00> : vector<128xf32>
    %15 = vector.multi_reduction <add>, %14, %cst_13 [0] : vector<32x128xf32> to vector<128xf32>
    %16 = vector.shape_cast %15 : vector<128xf32> to vector<1x128xf32>
    %cst_14 = arith.constant 3.125000e-02 : f32
    %17 = vector.broadcast %cst_14 : f32 to vector<1x128xf32>
    %18 = arith.mulf %16, %17 : vector<1x128xf32>
    %19 = arith.addf %13, %3 : vector<1x128xf32>
    %20 = arith.mulf %13, %13 : vector<1x128xf32>
    %21 = arith.subf %18, %20 : vector<1x128xf32>
    %cst_15 = arith.constant 0.000000e+00 : f32
    %22 = vector.broadcast %cst_15 : f32 to vector<1x128xf32>
    %23 = arith.maximumf %21, %22 : vector<1x128xf32>
    %cst_16 = arith.constant 9.99999974E-6 : f32
    %24 = vector.broadcast %cst_16 : f32 to vector<1x128xf32>
    %25 = arith.addf %23, %24 : vector<1x128xf32>
    %26 = math.rsqrt %25 : vector<1x128xf32>
    %27 = arith.mulf %8, %26 : vector<1x128xf32>
    %28 = arith.mulf %19, %27 : vector<1x128xf32>
    %29 = arith.subf %9, %28 : vector<1x128xf32>
    %30 = vector.broadcast %27 : vector<1x128xf32> to vector<32x128xf32>
    %31 = arith.mulf %5, %30 : vector<32x128xf32>
    %32 = vector.broadcast %29 : vector<1x128xf32> to vector<32x128xf32>
    %33 = arith.addf %31, %32 : vector<32x128xf32>
    %34 = vector.extract_strided_slice %33 {offsets = [0, 0], sizes = [32, 64], strides = [1, 1]} : vector<32x128xf32> to vector<32x64xf32>
    %c0_17 = arith.constant 0 : index
    %c0_18 = arith.constant 0 : index
    %35 = vector.load %arg9[%c0_17, %c0_18] : memref<32x64xf32, #tpu.memory_space<vmem>>, vector<32x64xf32>
    tpu.vector_store %arg9[%c0_17, %c0_18], %34 {strides = array<i32>} : memref<32x64xf32, #tpu.memory_space<vmem>>, vector<32x64xf32>,
    %cst_19 = arith.constant 0.000000e+00 : f32
    %36 = vector.broadcast %cst_19 : f32 to vector<32x128xf32>
    %37 = arith.cmpf oge, %33, %36 : vector<32x128xf32>
    %cst_20 = arith.constant 2.000000e-01 : f32
    %38 = vector.broadcast %cst_20 : f32 to vector<32x128xf32>
    %39 = arith.mulf %38, %33 : vector<32x128xf32>
    %40 = arith.select %37, %33, %39 : vector<32x128xi1>, vector<32x128xf32>
    %41 = vector.extract_strided_slice %40 {offsets = [0, 0], sizes = [32, 64], strides = [1, 1]} : vector<32x128xf32> to vector<32x64xf32>
    %c0_21 = arith.constant 0 : index
    %c0_22 = arith.constant 0 : index
    %42 = vector.load %arg10[%c0_21, %c0_22] : memref<32x64xf32, #tpu.memory_space<vmem>>, vector<32x64xf32>
    tpu.vector_store %arg10[%c0_21, %c0_22], %41 {strides = array<i32>} : memref<32x64xf32, #tpu.memory_space<vmem>>, vector<32x64xf32>,
    %c0_23 = arith.constant 0 : index
    %c0_24 = arith.constant 0 : index
    %43 = vector.load %arg6[%c0_23, %c0_24] : memref<1x128xf32, #tpu.memory_space<vmem>>, vector<1x128xf32>
    %44 = vector.broadcast %43 : vector<1x128xf32> to vector<32x128xf32>
    %45 = arith.mulf %40, %44 : vector<32x128xf32>
    %cst_25 = arith.constant dense<0.000000e+00> : vector<32xf32>
    %46 = vector.multi_reduction <add>, %45, %cst_25 [1] : vector<32x128xf32> to vector<32xf32>
    %47 = vector.shape_cast %46 : vector<32xf32> to vector<32x1xf32>
    %c0_26 = arith.constant 0 : index
    %c0_27 = arith.constant 0 : index
    %48 = vector.load %arg7[%c0_26, %c0_27] : memref<1x1xf32, #tpu.memory_space<vmem>>, vector<1x1xf32>
    %49 = vector.broadcast %48 : vector<1x1xf32> to vector<32x1xf32>
    %50 = arith.addf %47, %49 : vector<32x1xf32>
    %c0_28 = arith.constant 0 : index
    %c0_29 = arith.constant 0 : index
    %51 = vector.load %arg11[%c0_28, %c0_29] : memref<32x1xf32, #tpu.memory_space<vmem>>, vector<32x1xf32>
    tpu.vector_store %arg11[%c0_28, %c0_29], %50 {strides = array<i32>} : memref<32x1xf32, #tpu.memory_space<vmem>>, vector<32x1xf32>,
    return
  }
  func.func @transform_0(%arg0: i32) -> (i32, i32) {
    %c0_i32 = arith.constant 0 : i32
    %c0_i32_0 = arith.constant 0 : i32
    %c0_i32_1 = arith.constant 0 : i32
    return %c0_i32, %c0_i32_0 : i32, i32
  }
  func.func @transform_1(%arg0: i32) -> (i32, i32) {
    %c0_i32 = arith.constant 0 : i32
    %c0_i32_0 = arith.constant 0 : i32
    %c0_i32_1 = arith.constant 0 : i32
    return %c0_i32, %c0_i32_0 : i32, i32
  }
  func.func @transform_2(%arg0: i32) -> (i32, i32) {
    %c0_i32 = arith.constant 0 : i32
    %c0_i32_0 = arith.constant 0 : i32
    %c0_i32_1 = arith.constant 0 : i32
    return %c0_i32, %c0_i32_0 : i32, i32
  }
  func.func @transform_3(%arg0: i32) -> (i32, i32) {
    %c0_i32 = arith.constant 0 : i32
    %c0_i32_0 = arith.constant 0 : i32
    %c0_i32_1 = arith.constant 0 : i32
    return %c0_i32, %c0_i32_0 : i32, i32
  }
  func.func @transform_4(%arg0: i32) -> (i32, i32) {
    %c0_i32 = arith.constant 0 : i32
    %c0_i32_0 = arith.constant 0 : i32
    %c0_i32_1 = arith.constant 0 : i32
    return %c0_i32, %c0_i32_0 : i32, i32
  }
  func.func @transform_5(%arg0: i32) -> (i32, i32) {
    %c0_i32 = arith.constant 0 : i32
    %c0_i32_0 = arith.constant 0 : i32
    %c0_i32_1 = arith.constant 0 : i32
    return %c0_i32, %c0_i32_0 : i32, i32
  }
  func.func @transform_6(%arg0: i32) -> (i32, i32) {
    %c0_i32 = arith.constant 0 : i32
    %c0_i32_0 = arith.constant 0 : i32
    %c0_i32_1 = arith.constant 0 : i32
    return %c0_i32, %c0_i32_0 : i32, i32
  }
  func.func @transform_7(%arg0: i32) -> (i32, i32) {
    %c0_i32 = arith.constant 0 : i32
    %c0_i32_0 = arith.constant 0 : i32
    %c0_i32_1 = arith.constant 0 : i32
    return %c0_i32, %c0_i32_0 : i32, i32
  }
  func.func @transform_8(%arg0: i32) -> (i32, i32) {
    %c0_i32 = arith.constant 0 : i32
    %c0_i32_0 = arith.constant 0 : i32
    %c0_i32_1 = arith.constant 0 : i32
    return %c0_i32, %c0_i32_0 : i32, i32
  }
  func.func @transform_9(%arg0: i32) -> (i32, i32) {
    %c0_i32 = arith.constant 0 : i32
    %c0_i32_0 = arith.constant 0 : i32
    %c0_i32_1 = arith.constant 0 : i32
    return %c0_i32, %c0_i32_0 : i32, i32
  }
  func.func @transform_10(%arg0: i32) -> (i32, i32) {
    %c0_i32 = arith.constant 0 : i32
    %c0_i32_0 = arith.constant 0 : i32
    %c0_i32_1 = arith.constant 0 : i32
    return %c0_i32, %c0_i32_0 : i32, i32
  }
}

</mosaic_0001>

<bundles_post_ra>
// kernel: _lambda_.2
= control target key start
LH: loop header
LB: loop body
LE: loop exit
PB: predicated region body
PF: predicated region fallthrough
CT: control target
= control target key end

     0   :  { %13 = vsyncpa [#allocation3], 0  ;;  %s915_s0 = inlined_call_operand.vmem [shape: bf16[128,48], index: 0, kind: input, shape index: {}]   ;;  %s916_s1 = inlined_call_operand.vmem [shape: bf16[48,128], index: 1, kind: input, shape index: {}]   ;;  %s917_s2 = inlined_call_operand.vmem [shape: f32[1,128], index: 2, kind: input, shape index: {}]   ;;  %s918_s3 = inlined_call_operand.vmem [shape: f32[1,128], index: 3, kind: input, shape index: {}]   ;;  %s919_s4 = inlined_call_operand.vmem [shape: f32[1,128], index: 4, kind: input, shape index: {}]   ;;  %s920_s5 = inlined_call_operand.hbm [shape: f32[128,32], index: 5, kind: output, shape index: {0}]   ;;  %s921_s6 = inlined_call_operand.hbm [shape: f32[128,32], index: 6, kind: output, shape index: {1}]   ;;  %s922_s7 = inlined_call_operand.vmem [shape: f32[128,32], index: 7, kind: output, shape index: {2}]  }
   0x1   :  { %v517_v0 = vld [vmem:[%s916_s1 + $0x10] sm:$0xff]  ;;  %v516_v1 = vld [vmem:[%s916_s1 + $0x8] sm:$0xff] }
   0x2   :  { %136 = vmatpush.bf16.msra.mxu0 %v517_v0  ;;  %518 = vmatpush.bf16.msra.mxu1 %v517_v0 }
   0x3   :  { %519 = vmatpush.bf16.msra.mxu2 %v517_v0  ;;  %520 = vmatpush.bf16.msra.mxu3 %v517_v0 }
   0x4   :  { %14 = vsyncpa [#allocation5], 0  ;;  %v515_v2 = vld [vmem:[%s916_s1] sm:$0xff]  ;;  %v509_v4 = vld [vmem:[%s915_s0 + $0x10] sm:$0xff]  ;;  %vm106_vm0 = vcmask 392192   ;;  %vm200_vm1 = vcmask 261120  }
   0x5   :  { %v507_v3 = vld [vmem:[%s915_s0] sm:$0xff]  ;;  %v513_v6 = vld [vmem:[%s915_s0 + $0x30] sm:$0xff]  ;;  %v508_v7 = vld [vmem:[%s915_s0 + $0x8] sm:$0xff]  ;;  %s421_s27 = sshll.u32 %s920_s5, 4  ;;  %s587_s5 = smov 128   ;;  %s422_s27 = int_to_ptr.hbm [resolvable:$true] %s421_s27 }
   0x6   :  { %137 = vmatpush.bf16.msra.mxu0 %v516_v1  ;;  %521 = vmatpush.bf16.msra.mxu1 %v516_v1  ;;  %v511_v5 = vld [vmem:[%s915_s0 + $0x20] sm:$0xff]  ;;  %v510_v8 = vld [vmem:[%s915_s0 + $0x18] sm:$0xff]  ;;  %v512_v9 = vld [vmem:[%s915_s0 + $0x28] sm:$0xff]  ;;  %s588_s28 = smov 8   ;;  %s589_s30 = smov [#allocation4]  }
   0x7   :  { %522 = vmatpush.bf16.msra.mxu2 %v516_v1  ;;  %523 = vmatpush.bf16.msra.mxu3 %v516_v1  ;;  %v514_v10 = vld [vmem:[%s915_s0 + $0x38] sm:$0xff]  ;;  %v674_v11 = vld [vmem:[%s917_s2] ss:$0 sm:$0xff]  ;;  %s586_s0 = smov [#allocation2]   ;;  %s432_s8 = sshll.u32 %s589_s30, 4  ;;  %s433_s8 = int_to_ptr.vmem [resolvable:$true] %s432_s8 }
   0x8   :  { %s419_s24 = sshll.u32 %s586_s0, 4  ;;  %s434_s11 = sshll.u32 %s921_s6, 4  ;;  %s420_s24 = int_to_ptr.vmem [resolvable:$true] %s419_s24  ;;  %s435_s11 = int_to_ptr.hbm [resolvable:$true] %s434_s11 }
   0xa   :  { %138 = vmatpush.bf16.msra.mxu0 %v515_v2  ;;  %524 = vmatpush.bf16.msra.mxu1 %v515_v2 }
   0xb   :  { %525 = vmatpush.bf16.msra.mxu2 %v515_v2  ;;  %526 = vmatpush.bf16.msra.mxu3 %v515_v2 }
   0xd   :  { %499 = vmatmul.msk.bf16.vlgmr.msra.gmra.mxu0 %vm106_vm0, %v507_v3  ;;  %501 = vmatmul.msk.bf16.vlgmr.msra.gmra.mxu1 %vm106_vm0, %v509_v4 }
   0xe   :  { %503 = vmatmul.msk.bf16.vlgmr.msra.gmra.mxu2 %vm106_vm0, %v511_v5  ;;  %505 = vmatmul.msk.bf16.vlgmr.msra.gmra.mxu3 %vm106_vm0, %v513_v6 }
  0x1d   :  { %500 = vmatmul.msk.bf16.gmra.mxu0 %vm106_vm0, %v508_v7  ;;  %502 = vmatmul.msk.bf16.gmra.mxu1 %vm106_vm0, %v510_v8 }
  0x1e   :  { %504 = vmatmul.msk.bf16.gmra.mxu2 %vm106_vm0, %v512_v9  ;;  %506 = vmatmul.msk.bf16.gmra.mxu3 %vm106_vm0, %v514_v10 }
  0x8a   :  { %v140_v12 = vpop.f32.mrf.mxu0  ;;  %v150_v13 = vpop.f32.mrf.mxu1 }
  0x8b   :  { %v677_v14 = vadd.f32 %v674_v11, %v140_v12  ;;  %v680_v15 = vadd.f32 %v674_v11, %v150_v13  ;;  %v241_v33 = vmul.f32 %v140_v12, %v140_v12  ;;  %v245_v49 = vmul.f32 %v150_v13, %v150_v13 }
  0x8d   :  { %201 = vst.msk [vmem:[#allocation2] sm:$0xff] %vm200_vm1, %v677_v14 }
  0x8e   :  { %205 = vst.msk [vmem:[#allocation2 + $0x20] sm:$0xff] %vm200_vm1, %v680_v15 }
  0x91   :  { %v686_v16 = vpop.f32.mrf.mxu2  ;;  %v688_v17 = vpop.f32.mrf.mxu3 }
  0x92   :  { %v142_v18 = vpop.f32.mrf.mxu0  ;;  %v152_v19 = vpop.f32.mrf.mxu1  ;;  %v692_v20 = vadd.f32 %v674_v11, %v686_v16  ;;  %v702_v23 = vadd.f32 %v674_v11, %v688_v17  ;;  %v249_v1 = vmul.f32 %v686_v16, %v686_v16 }
  0x93   :  { %v695_v21 = vadd.f32 %v674_v11, %v142_v18  ;;  %v698_v22 = vadd.f32 %v674_v11, %v152_v19  ;;  %v242_v32 = vmul.f32 %v142_v18, %v142_v18  ;;  %v219_v35 = vadd.f32 %v142_v18, %v140_v12 }
  0x94   :  { %209 = vst.msk [vmem:[#allocation2 + $0x40] sm:$0xff] %vm200_vm1, %v692_v20  ;;  %v246_v52 = vmul.f32 %v152_v19, %v152_v19 }
  0x95   :  { %202 = vst.msk [vmem:[#allocation2 + $0x8] sm:$0xff] %vm200_vm1, %v695_v21  ;;  %v257_v36 = vadd.f32 %v242_v32, %v241_v33 }
  0x96   :  { %206 = vst.msk [vmem:[#allocation2 + $0x28] sm:$0xff] %vm200_vm1, %v698_v22 }
  0x97   :  { %213 = vst.msk [vmem:[#allocation2 + $0x60] sm:$0xff] %vm200_vm1, %v702_v23 }
  0x99   :  { %v712_v24 = vpop.f32.mrf.mxu2  ;;  %v714_v25 = vpop.f32.mrf.mxu3 }
  0x9a   :  { %v145_v26 = vpop.f32.mrf.mxu0  ;;  %v155_v27 = vpop.f32.mrf.mxu1  ;;  %v718_v28 = vadd.f32 %v674_v11, %v712_v24  ;;  %v728_v31 = vadd.f32 %v674_v11, %v714_v25  ;;  %v250_v4 = vmul.f32 %v712_v24, %v712_v24 }
  0x9b   :  { %v721_v29 = vadd.f32 %v674_v11, %v145_v26  ;;  %v724_v30 = vadd.f32 %v674_v11, %v155_v27  ;;  %v243_v34 = vmul.f32 %v145_v26, %v145_v26  ;;  %v220_v37 = vadd.f32 %v219_v35, %v145_v26 }
  0x9c   :  { %210 = vst.msk [vmem:[#allocation2 + $0x48] sm:$0xff] %vm200_vm1, %v718_v28  ;;  %v247_v55 = vmul.f32 %v155_v27, %v155_v27 }
  0x9d   :  { %203 = vst.msk [vmem:[#allocation2 + $0x10] sm:$0xff] %vm200_vm1, %v721_v29  ;;  %v258_v40 = vadd.f32 %v257_v36, %v243_v34 }
  0x9e   :  { %207 = vst.msk [vmem:[#allocation2 + $0x30] sm:$0xff] %vm200_vm1, %v724_v30 }
  0x9f   :  { %214 = vst.msk [vmem:[#allocation2 + $0x68] sm:$0xff] %vm200_vm1, %v728_v31 }
  0xa1   :  { %v165_v38 = vpop.f32.mrf.mxu2  ;;  %v175_v39 = vpop.f32.mrf.mxu3 }
  0xa2   :  { %v147_v41 = vpop.f32.mrf.mxu0  ;;  %v157_v42 = vpop.f32.mrf.mxu1  ;;  %v739_v43 = vadd.f32 %v674_v11, %v165_v38  ;;  %v742_v44 = vadd.f32 %v674_v11, %v175_v39  ;;  %v251_v8 = vmul.f32 %v165_v38, %v165_v38 }
  0xa3   :  { %v745_v45 = vadd.f32 %v674_v11, %v147_v41  ;;  %v221_v46 = vadd.f32 %v220_v37, %v147_v41  ;;  %v244_v47 = vmul.f32 %v147_v41, %v147_v41  ;;  %v748_v48 = vadd.f32 %v674_v11, %v157_v42 }
  0xa4   :  { %211 = vst.msk [vmem:[#allocation2 + $0x50] sm:$0xff] %vm200_vm1, %v739_v43  ;;  %v248_v63 = vmul.f32 %v157_v42, %v157_v42 }
  0xa5   :  { %204 = vst.msk [vmem:[#allocation2 + $0x18] sm:$0xff] %vm200_vm1, %v745_v45  ;;  %v222_v50 = vadd.f32 %v221_v46, %v150_v13  ;;  %v259_v51 = vadd.f32 %v258_v40, %v244_v47  ;;  %v253_v13 = vmul.f32 %v688_v17, %v688_v17 }
  0xa6   :  { %208 = vst.msk [vmem:[#allocation2 + $0x38] sm:$0xff] %vm200_vm1, %v748_v48 }
  0xa7   :  { %v260_v53 = vadd.f32 %v259_v51, %v245_v49  ;;  %v223_v54 = vadd.f32 %v222_v50, %v152_v19  ;;  %215 = vst.msk [vmem:[#allocation2 + $0x70] sm:$0xff] %vm200_vm1, %v742_v44  ;;  %v254_v19 = vmul.f32 %v714_v25, %v714_v25 }
  0xa9   :  { %v224_v56 = vadd.f32 %v223_v54, %v155_v27  ;;  %v261_v57 = vadd.f32 %v260_v53, %v246_v52  ;;  %v167_v58 = vpop.f32.mrf.mxu2  ;;  %v177_v59 = vpop.f32.mrf.mxu3 }
  0xaa   :  { %v762_v60 = vadd.f32 %v674_v11, %v167_v58  ;;  %v765_v61 = vadd.f32 %v674_v11, %v177_v59  ;;  %v252_v12 = vmul.f32 %v167_v58, %v167_v58  ;;  %v256_v36 = vmul.f32 %v177_v59, %v177_v59 }
  0xab   :  { %v225_v62 = vadd.f32 %v224_v56, %v157_v42  ;;  %v262_v0 = vadd.f32 %v261_v57, %v247_v55 }
  0xac   :  { %212 = vst.msk [vmem:[#allocation2 + $0x58] sm:$0xff] %vm200_vm1, %v762_v60 }
  0xad   :  { %v226_v2 = vadd.f32 %v225_v62, %v686_v16  ;;  %v263_v3 = vadd.f32 %v262_v0, %v248_v63  ;;  %216 = vst.msk [vmem:[#allocation2 + $0x78] sm:$0xff] %vm200_vm1, %v765_v61 }
  0xae   :  { %427 = dma.vmem_to_hbm [thread:$0]  %s420_s24, 2048, %s422_s27, [#allocation3], %s587_s5, %s587_s5, %s588_s28  }
  0xaf   :  { %v264_v5 = vadd.f32 %v263_v3, %v249_v1  ;;  %v227_v6 = vadd.f32 %v226_v2, %v712_v24  ;;  %v255_v24 = vmul.f32 %v175_v39, %v175_v39  ;;  %v180_v1 = vld [vmem:[%s917_s2] sm:$0x1] }
  0xb0   :  { %v217_v2 = vld [vmem:[%s918_s3] sm:$0x1] }
  0xb1   :  { %v228_v7 = vadd.f32 %v227_v6, %v165_v38  ;;  %v265_v9 = vadd.f32 %v264_v5, %v250_v4 }
  0xb3   :  { %v266_v10 = vadd.f32 %v265_v9, %v251_v8  ;;  %v229_v11 = vadd.f32 %v228_v7, %v167_v58  ;;  %v218_v7 = vld [vmem:[%s919_s4] sm:$0x1] }
  0xb5   :  { %v230_v16 = vadd.f32 %v229_v11, %v688_v17  ;;  %v267_v18 = vadd.f32 %v266_v10, %v252_v12 }
  0xb7   :  { %v268_v26 = vadd.f32 %v267_v18, %v253_v13  ;;  %v231_v27 = vadd.f32 %v230_v16, %v714_v25 }
  0xb9   :  { %v232_v32 = vadd.f32 %v231_v27, %v175_v39  ;;  %v269_v33 = vadd.f32 %v268_v26, %v254_v19 }
  0xbb   :  { %v270_v34 = vadd.f32 %v269_v33, %v255_v24  ;;  %v233_v35 = vadd.f32 %v232_v32, %v177_v59 }
  0xbd   :  { %v234_v37 = vrot.slane %v233_v35, 4  ;;  %v271_v38 = vadd.f32 %v270_v34, %v256_v36 }
  0xbf   :  { %v235_v40 = vadd.f32 %v234_v37, %v233_v35  ;;  %v272_v41 = vrot.slane %v271_v38, 4 }
  0xc1   :  { %v236_v42 = vrot.slane %v235_v40, 2  ;;  %v273_v46 = vadd.f32 %v272_v41, %v271_v38 }
  0xc3   :  { %v237_v17 = vadd.f32 %v236_v42, %v235_v40  ;;  %v274_v47 = vrot.slane %v273_v46, 2 }
  0xc5   :  { %v238_v49 = vrot.slane %v237_v17, 1  ;;  %v275_v50 = vadd.f32 %v274_v47, %v273_v46 }
  0xc7   :  { %v239_v51 = vadd.f32 %v238_v49, %v237_v17  ;;  %v276_v52 = vrot.slane %v275_v50, 1 }
  0xc9   :  { %v240_v53 = vmul.f32 0.0078125, %v239_v51  ;;  %v277_v25 = vadd.f32 %v276_v52, %v275_v50 }
  0xcb   :  { %v278_v54 = vmul.f32 0.0078125, %v277_v25  ;;  %v280_v39 = vmul.f32 %v240_v53, %v240_v53  ;;  %v279_v5 = vadd.f32 %v240_v53, %v180_v1 }
  0xcd   :  { %v281_v55 = vsub.f32 %v278_v54, %v280_v39 }
  0xcf   :  { %v282_v56 = vmax.f32 %v281_v55, 0.0 }
  0xd1   :  { %v283_v57 = vadd.f32 1e-05, %v282_v56 }
  0xd3   :  { %532 = vrsqrt.f32 %v283_v57  ;;  %vm290_vm3 = vweird.f32 %v283_v57 }
  0xd9   :  { %v533_v58 = vpop.eup %532 }
  0xda   :  { %v285_v59 = vmul.f32 %v533_v58, %v283_v57  ;;  %vm291_vm2 = vweird.f32 %v533_v58 }
  0xdb   :  { %vm292_vm4 = vmor %vm290_vm3, %vm291_vm2 }
  0xdc   :  { %v286_v62 = vmul.f32 %v533_v58, %v285_v59 }
  0xde   :  { %v287_v63 = vmul.f32 0.5, %v286_v62 }
  0xe0   :  { %v288_v0 = vsub.f32 1.5, %v287_v63 }
  0xe2   :  { %v289_v3 = vmul.f32 %v533_v58, %v288_v0 }
  0xe4   :  { %v293_v4 = vsel %vm292_vm4, %v533_v58, %v289_v3 }
  0xe5   :  { %v294_v6 = vmul.f32 %v293_v4, %v217_v2 }
  0xe7   :  { %v295_v8 = vmul.f32 %v294_v6, %v279_v5  ;;  %v298_v9 = vperm.slane %v294_v6, 0 }
  0xe9   :  { %v296_v10 = vsub.f32 %v218_v7, %v295_v8  ;;  %v315_v11 = vmul.f32 %v298_v9, %v765_v61  ;;  %v300_v13 = vmul.f32 %v298_v9, %v677_v14  ;;  %v301_v16 = vmul.f32 %v298_v9, %v695_v21 }
  0xea   :  { %v302_v19 = vmul.f32 %v298_v9, %v721_v29  ;;  %v303_v27 = vmul.f32 %v298_v9, %v745_v45  ;;  %v304_v33 = vmul.f32 %v298_v9, %v680_v15  ;;  %v305_v61 = vmul.f32 %v298_v9, %v698_v22 }
  0xeb   :  { %v317_v12 = vperm.slane %v296_v10, 0  ;;  %v306_v21 = vmul.f32 %v298_v9, %v724_v30  ;;  %v307_v45 = vmul.f32 %v298_v9, %v748_v48  ;;  %v308_v36 = vmul.f32 %v298_v9, %v692_v20 }
  0xec   :  { %v309_v37 = vmul.f32 %v298_v9, %v718_v28  ;;  %v310_v30 = vmul.f32 %v298_v9, %v739_v43  ;;  %v311_v41 = vmul.f32 %v298_v9, %v762_v60  ;;  %v312_v20 = vmul.f32 %v298_v9, %v702_v23 }
  0xed   :  { %v334_v18 = vadd.f32 %v317_v12, %v315_v11  ;;  %v319_v26 = vadd.f32 %v317_v12, %v300_v13  ;;  %v320_v32 = vadd.f32 %v317_v12, %v301_v16  ;;  %v321_v34 = vadd.f32 %v317_v12, %v302_v19 }
  0xee   :  { %v322_v35 = vadd.f32 %v317_v12, %v303_v27  ;;  %v323_v29 = vadd.f32 %v317_v12, %v304_v33  ;;  %v324_v15 = vadd.f32 %v317_v12, %v305_v61  ;;  %v325_v22 = vadd.f32 %v317_v12, %v306_v21 }
  0xef   :  { %350 = vst.msk [vmem:[#allocation4 + $0x78] sm:$0xff] %vm200_vm1, %v334_v18  ;;  %vm366_vm5 = vcmp.ge.f32.partialorder %v334_v18, 0.0  ;;  %v382_v24 = vmul.f32 0.2, %v334_v18  ;;  %v326_v38 = vadd.f32 %v317_v12, %v307_v45  ;;  %v327_v40 = vadd.f32 %v317_v12, %v308_v36 }
  0xf0   :  { %335 = vst.msk [vmem:[#allocation4] sm:$0xff] %vm200_vm1, %v319_v26  ;;  %v328_v42 = vadd.f32 %v317_v12, %v309_v37  ;;  %v820_v48 = vadd.f32 %v317_v12, %v310_v30  ;;  %v313_v28 = vmul.f32 %v298_v9, %v728_v31  ;;  %v824_v46 = vadd.f32 %v317_v12, %v311_v41 }
  0xf1   :  { %v398_v14 = vsel %vm366_vm5, %v334_v18, %v382_v24  ;;  %336 = vst.msk [vmem:[#allocation4 + $0x8] sm:$0xff] %vm200_vm1, %v320_v32  ;;  %v314_v43 = vmul.f32 %v298_v9, %v742_v44  ;;  %v331_v17 = vadd.f32 %v317_v12, %v312_v20  ;;  %v367_v60 = vmul.f32 0.2, %v319_v26 }
  0xf2   :  { %414 = vst.msk [vmem:[%s922_s7 + $0x78] sm:$0xff] %vm200_vm1, %v398_v14  ;;  %v829_v47 = vadd.f32 %v317_v12, %v313_v28  ;;  %vm351_vm6 = vcmp.ge.f32.partialorder %v319_v26, 0.0  ;;  %v368_v23 = vmul.f32 0.2, %v320_v32  ;;  %vm352_vm7 = vcmp.ge.f32.partialorder %v320_v32, 0.0 }
  0xf3   :  { %337 = vst.msk [vmem:[#allocation4 + $0x10] sm:$0xff] %vm200_vm1, %v321_v34  ;;  %v333_v49 = vadd.f32 %v317_v12, %v314_v43  ;;  %v369_v31 = vmul.f32 0.2, %v321_v34  ;;  %vm353_vm8 = vcmp.ge.f32.partialorder %v321_v34, 0.0  ;;  %v370_v44 = vmul.f32 0.2, %v322_v35 }
  0xf4   :  { %338 = vst.msk [vmem:[#allocation4 + $0x18] sm:$0xff] %vm200_vm1, %v322_v35  ;;  %vm354_vm9 = vcmp.ge.f32.partialorder %v322_v35, 0.0  ;;  %v371_v50 = vmul.f32 0.2, %v323_v29  ;;  %v383_v51 = vsel %vm351_vm6, %v319_v26, %v367_v60  ;;  %vm355_vm10 = vcmp.ge.f32.partialorder %v323_v29, 0.0 }
  0xf5   :  { %339 = vst.msk [vmem:[#allocation4 + $0x20] sm:$0xff] %vm200_vm1, %v323_v29  ;;  %v372_v52 = vmul.f32 0.2, %v324_v15  ;;  %v384_v53 = vsel %vm352_vm7, %v320_v32, %v368_v23  ;;  %vm356_vm11 = vcmp.ge.f32.partialorder %v324_v15, 0.0  ;;  %v373_v25 = vmul.f32 0.2, %v325_v22 }
  0xf6   :  { %340 = vst.msk [vmem:[#allocation4 + $0x28] sm:$0xff] %vm200_vm1, %v324_v15  ;;  %v385_v54 = vsel %vm353_vm8, %v321_v34, %v369_v31  ;;  %vm357_vm12 = vcmp.ge.f32.partialorder %v325_v22, 0.0  ;;  %v374_v39 = vmul.f32 0.2, %v326_v38  ;;  %v386_v55 = vsel %vm354_vm9, %v322_v35, %v370_v44 }
  0xf7   :  { %341 = vst.msk [vmem:[#allocation4 + $0x30] sm:$0xff] %vm200_vm1, %v325_v22  ;;  %vm358_vm13 = vcmp.ge.f32.partialorder %v326_v38, 0.0  ;;  %v375_v56 = vmul.f32 0.2, %v327_v40  ;;  %v387_v57 = vsel %vm355_vm10, %v323_v29, %v371_v50  ;;  %vm359_vm14 = vcmp.ge.f32.partialorder %v327_v40, 0.0 }
  0xf8   :  { %342 = vst.msk [vmem:[#allocation4 + $0x38] sm:$0xff] %vm200_vm1, %v326_v38  ;;  %v376_v58 = vmul.f32 0.2, %v328_v42  ;;  %v388_v59 = vsel %vm356_vm11, %v324_v15, %v372_v52  ;;  %vm360_vm15 = vcmp.ge.f32.partialorder %v328_v42, 0.0  ;;  %v377_v62 = vmul.f32 0.2, %v820_v48 }
  0xf9   :  { %343 = vst.msk [vmem:[#allocation4 + $0x40] sm:$0xff] %vm200_vm1, %v327_v40  ;;  %v389_v63 = vsel %vm357_vm12, %v325_v22, %v373_v25  ;;  %vm361_vm0 = vcmp.ge.f32.partialorder %v820_v48, 0.0  ;;  %v378_v0 = vmul.f32 0.2, %v824_v46  ;;  %v390_v1 = vsel %vm358_vm13, %v326_v38, %v374_v39 }
  0xfa   :  { %344 = vst.msk [vmem:[#allocation4 + $0x48] sm:$0xff] %vm200_vm1, %v328_v42  ;;  %vm362_vm2 = vcmp.ge.f32.partialorder %v824_v46, 0.0  ;;  %v379_v2 = vmul.f32 0.2, %v331_v17  ;;  %v391_v3 = vsel %vm359_vm14, %v327_v40, %v375_v56  ;;  %vm363_vm3 = vcmp.ge.f32.partialorder %v331_v17, 0.0 }
  0xfb   :  { %345 = vst.msk [vmem:[#allocation4 + $0x50] sm:$0xff] %vm200_vm1, %v820_v48  ;;  %v380_v4 = vmul.f32 0.2, %v829_v47  ;;  %v392_v5 = vsel %vm360_vm15, %v328_v42, %v376_v58  ;;  %vm364_vm4 = vcmp.ge.f32.partialorder %v829_v47, 0.0  ;;  %v381_v6 = vmul.f32 0.2, %v333_v49 }
  0xfc   :  { %346 = vst.msk [vmem:[#allocation4 + $0x58] sm:$0xff] %vm200_vm1, %v824_v46  ;;  %v393_v7 = vsel %vm361_vm0, %v820_v48, %v377_v62  ;;  %vm365_vm5 = vcmp.ge.f32.partialorder %v333_v49, 0.0  ;;  %v394_v8 = vsel %vm362_vm2, %v824_v46, %v378_v0  ;;  %v395_v9 = vsel %vm363_vm3, %v331_v17, %v379_v2 }
  0xfd   :  { %347 = vst.msk [vmem:[#allocation4 + $0x60] sm:$0xff] %vm200_vm1, %v331_v17  ;;  %v396_v10 = vsel %vm364_vm4, %v829_v47, %v380_v4  ;;  %v397_v11 = vsel %vm365_vm5, %v333_v49, %v381_v6 }
  0xfe   :  { %348 = vst.msk [vmem:[#allocation4 + $0x68] sm:$0xff] %vm200_vm1, %v829_v47 }
  0xff   :  { %349 = vst.msk [vmem:[#allocation4 + $0x70] sm:$0xff] %vm200_vm1, %v333_v49 }
 0x100   :  { %399 = vst.msk [vmem:[%s922_s7] sm:$0xff] %vm200_vm1, %v383_v51 }
 0x101   :  { %400 = vst.msk [vmem:[%s922_s7 + $0x8] sm:$0xff] %vm200_vm1, %v384_v53 }
 0x102   :  { %401 = vst.msk [vmem:[%s922_s7 + $0x10] sm:$0xff] %vm200_vm1, %v385_v54 }
 0x103   :  { %402 = vst.msk [vmem:[%s922_s7 + $0x18] sm:$0xff] %vm200_vm1, %v386_v55 }
 0x104   :  { %403 = vst.msk [vmem:[%s922_s7 + $0x20] sm:$0xff] %vm200_vm1, %v387_v57 }
 0x105   :  { %404 = vst.msk [vmem:[%s922_s7 + $0x28] sm:$0xff] %vm200_vm1, %v388_v59 }
 0x106   :  { %405 = vst.msk [vmem:[%s922_s7 + $0x30] sm:$0xff] %vm200_vm1, %v389_v63 }
 0x107   :  { %406 = vst.msk [vmem:[%s922_s7 + $0x38] sm:$0xff] %vm200_vm1, %v390_v1 }
 0x108   :  { %407 = vst.msk [vmem:[%s922_s7 + $0x40] sm:$0xff] %vm200_vm1, %v391_v3 }
 0x109   :  { %408 = vst.msk [vmem:[%s922_s7 + $0x48] sm:$0xff] %vm200_vm1, %v392_v5 }
 0x10a   :  { %409 = vst.msk [vmem:[%s922_s7 + $0x50] sm:$0xff] %vm200_vm1, %v393_v7 }
 0x10b   :  { %410 = vst.msk [vmem:[%s922_s7 + $0x58] sm:$0xff] %vm200_vm1, %v394_v8 }
 0x10c   :  { %411 = vst.msk [vmem:[%s922_s7 + $0x60] sm:$0xff] %vm200_vm1, %v395_v9 }
 0x10d   :  { %412 = vst.msk [vmem:[%s922_s7 + $0x68] sm:$0xff] %vm200_vm1, %v396_v10 }
 0x10e   :  { %413 = vst.msk [vmem:[%s922_s7 + $0x70] sm:$0xff] %vm200_vm1, %v397_v11 }
 0x10f   :  { %440 = dma.vmem_to_hbm [thread:$0]  %s433_s8, 2048, %s435_s11, [#allocation5], %s587_s5, %s587_s5, %s588_s28  }
 0x110   :  { %582 = dma.done.wait [#allocation3], 2048  }
 0x111   :  { %583 = vsyncadd [#allocation3], 4294965248 }
 0x112   :  { %584 = dma.done.wait [#allocation5], 2048  }
 0x113   :  { %585 = vsyncadd [#allocation5], 4294965248 }
 0x114   :  { %453 = vsyncpa [#allocation3], 1 }
 0x115   :  { %454 = vsyncpa [#allocation5], 1 }

// kernel: _lambda_.3
= control target key start
LH: loop header
LB: loop body
LE: loop exit
PB: predicated region body
PF: predicated region fallthrough
CT: control target
= control target key end

     0   :  { %s1140_s0 = inlined_call_operand.vmem [shape: bf16[32,512], index: 0, kind: input, shape index: {}]   ;;  %s1141_s1 = inlined_call_operand.vmem [shape: bf16[512,128], index: 1, kind: input, shape index: {}]   ;;  %s1142_s2 = inlined_call_operand.vmem [shape: f32[1,128], index: 2, kind: input, shape index: {}]   ;;  %s1143_s3 = inlined_call_operand.vmem [shape: f32[1,128], index: 3, kind: input, shape index: {}]   ;;  %s1144_s4 = inlined_call_operand.vmem [shape: f32[1,128], index: 4, kind: input, shape index: {}]   ;;  %s1145_s5 = inlined_call_operand.vmem [shape: f32[1,128], index: 5, kind: input, shape index: {}]   ;;  %s1146_s6 = inlined_call_operand.<no memory space> [shape: f32[1,1], index: 6, kind: input, shape index: {}]   ;;  %s1147_s7 = inlined_call_operand.hbm [shape: f32[32,64], index: 7, kind: output, shape index: {0}]   ;;  %s1148_s8 = inlined_call_operand.hbm [shape: f32[32,64], index: 8, kind: output, shape index: {1}]   ;;  %s1149_s9 = inlined_call_operand.hbm [shape: f32[32,64], index: 9, kind: output, shape index: {2}]   ;;  %s1150_s10 = inlined_call_operand.vmem [shape: f32[32,1], index: 10, kind: output, shape index: {3}]  }
   0x1   :  { %v16_v0 = vstv %s1146_s6 }
   0x2   :  { %17 = vst [vmem:[#allocation2] sm:$0x1] %v16_v0 }
   0x3   :  { %18 = vsyncpa [#allocation4], 0  ;;  %v766_v1 = vld [vmem:[%s1141_s1 + $0x38] sm:$0xff]  ;;  %v765_v5 = vld [vmem:[%s1141_s1 + $0x30] sm:$0xff] }
   0x4   :  { %v774_v2 = vld [vmem:[%s1141_s1 + $0x78] sm:$0xff]  ;;  %338 = vmatpush.bf16.msra.mxu0 %v766_v1  ;;  %v773_v6 = vld [vmem:[%s1141_s1 + $0x70] sm:$0xff]  ;;  %v764_v9 = vld [vmem:[%s1141_s1 + $0x28] sm:$0xff] }
   0x5   :  { %v782_v3 = vld [vmem:[%s1141_s1 + $0xb8] sm:$0xff]  ;;  %357 = vmatpush.bf16.msra.mxu1 %v774_v2  ;;  %v781_v7 = vld [vmem:[%s1141_s1 + $0xb0] sm:$0xff]  ;;  %v772_v10 = vld [vmem:[%s1141_s1 + $0x68] sm:$0xff] }
   0x6   :  { %v790_v4 = vld [vmem:[%s1141_s1 + $0xf8] sm:$0xff]  ;;  %376 = vmatpush.bf16.msra.mxu2 %v782_v3  ;;  %v789_v8 = vld [vmem:[%s1141_s1 + $0xf0] sm:$0xff]  ;;  %v780_v11 = vld [vmem:[%s1141_s1 + $0xa8] sm:$0xff] }
   0x7   :  { %395 = vmatpush.bf16.msra.mxu3 %v790_v4  ;;  %v788_v12 = vld [vmem:[%s1141_s1 + $0xe8] sm:$0xff]  ;;  %v763_v13 = vld [vmem:[%s1141_s1 + $0x20] sm:$0xff]  ;;  %v762_v17 = vld [vmem:[%s1141_s1 + $0x18] sm:$0xff] }
   0x8   :  { %339 = vmatpush.bf16.msra.mxu0 %v765_v5  ;;  %v771_v14 = vld [vmem:[%s1141_s1 + $0x60] sm:$0xff]  ;;  %v770_v18 = vld [vmem:[%s1141_s1 + $0x58] sm:$0xff] }
   0x9   :  { %358 = vmatpush.bf16.msra.mxu1 %v773_v6  ;;  %v779_v15 = vld [vmem:[%s1141_s1 + $0xa0] sm:$0xff] }
   0xa   :  { %377 = vmatpush.bf16.msra.mxu2 %v781_v7  ;;  %v787_v16 = vld [vmem:[%s1141_s1 + $0xe0] sm:$0xff] }
   0xb   :  { %396 = vmatpush.bf16.msra.mxu3 %v789_v8 }
   0xc   :  { %340 = vmatpush.bf16.msra.mxu0 %v764_v9 }
   0xd   :  { %359 = vmatpush.bf16.msra.mxu1 %v772_v10 }
   0xe   :  { %378 = vmatpush.bf16.msra.mxu2 %v780_v11 }
   0xf   :  { %397 = vmatpush.bf16.msra.mxu3 %v788_v12 }
  0x10   :  { %341 = vmatpush.bf16.msra.mxu0 %v763_v13 }
  0x11   :  { %360 = vmatpush.bf16.msra.mxu1 %v771_v14 }
  0x12   :  { %19 = vsyncpa [#allocation6], 0  ;;  %379 = vmatpush.bf16.msra.mxu2 %v779_v15  ;;  %v778_v19 = vld [vmem:[%s1141_s1 + $0x98] sm:$0xff]  ;;  %v761_v21 = vld [vmem:[%s1141_s1 + $0x10] sm:$0xff]  ;;  %vm422_vm0 = vcmask 523264   ;;  %s553_s11 = sshll.u32 %s1148_s8, 4  ;;  %s554_s11 = int_to_ptr.hbm [resolvable:$true] %s553_s11 }
  0x13   :  { %398 = vmatpush.bf16.msra.mxu3 %v787_v16  ;;  %v786_v20 = vld [vmem:[%s1141_s1 + $0xd8] sm:$0xff]  ;;  %v769_v22 = vld [vmem:[%s1141_s1 + $0x50] sm:$0xff]  ;;  %v760_v25 = vld [vmem:[%s1141_s1 + $0x8] sm:$0xff]  ;;  %s877_s12 = smov [#allocation5]   ;;  %s878_s14 = smov 128   ;;  %vm529_vm8 = vcmask 7168  }
  0x14   :  { %342 = vmatpush.bf16.msra.mxu0 %v762_v17  ;;  %v777_v23 = vld [vmem:[%s1141_s1 + $0x90] sm:$0xff]  ;;  %v768_v26 = vld [vmem:[%s1141_s1 + $0x48] sm:$0xff]  ;;  %v759_v29 = vld [vmem:[%s1141_s1] sm:$0xff]  ;;  %s551_s13 = sshll.u32 %s877_s12, 4  ;;  %s879_s15 = smov 8   ;;  %s552_s13 = int_to_ptr.vmem [resolvable:$true] %s551_s13 }
  0x15   :  { %361 = vmatpush.bf16.msra.mxu1 %v770_v18  ;;  %v785_v24 = vld [vmem:[%s1141_s1 + $0xd0] sm:$0xff]  ;;  %v776_v27 = vld [vmem:[%s1141_s1 + $0x88] sm:$0xff]  ;;  %v767_v30 = vld [vmem:[%s1141_s1 + $0x40] sm:$0xff]  ;;  %s880_s16 = smov [#allocation3]   ;;  %s540_s20 = sshll.u32 %s1147_s7, 4  ;;  %s541_s20 = int_to_ptr.hbm [resolvable:$true] %s540_s20 }
  0x16   :  { %380 = vmatpush.bf16.msra.mxu2 %v778_v19  ;;  %v784_v28 = vld [vmem:[%s1141_s1 + $0xc8] sm:$0xff]  ;;  %v775_v31 = vld [vmem:[%s1141_s1 + $0x80] sm:$0xff]  ;;  %v753_v34 = vld [vmem:[%s1140_s0 + $0xc] sm:$0xf0]  ;;  %s538_s17 = sshll.u32 %s880_s16, 4  ;;  %s566_s22 = sshll.u32 %s1149_s9, 4  ;;  %s539_s17 = int_to_ptr.vmem [resolvable:$true] %s538_s17  ;;  %s567_s22 = int_to_ptr.hbm [resolvable:$true] %s566_s22 }
  0x17   :  { %399 = vmatpush.bf16.msra.mxu3 %v786_v20  ;;  %v783_v32 = vld [vmem:[%s1141_s1 + $0xc0] sm:$0xff]  ;;  %v595_v36 = vld [vmem:[%s1140_s0 + $0x10] sm:$0xf0]  ;;  %v601_v37 = vld [vmem:[%s1140_s0 + $0x8] sm:$0xf]  ;;  %s881_s6 = smov [#allocation7]  }
  0x18   :  { %343 = vmatpush.bf16.msra.mxu0 %v761_v21  ;;  %v593_v33 = vld [vmem:[%s1140_s0] sm:$0xf]  ;;  %v751_v35 = vld [vmem:[%s1140_s0 + $0x4] sm:$0xf]  ;;  %v754_v38 = vld [vmem:[%s1140_s0 + $0x14] sm:$0xf0] }
  0x19   :  { %362 = vmatpush.bf16.msra.mxu1 %v769_v22  ;;  %v752_v39 = vld [vmem:[%s1140_s0 + $0xc] sm:$0xf]  ;;  %v603_v40 = vld [vmem:[%s1140_s0 + $0x18] sm:$0xf0]  ;;  %v594_v41 = vor.u32 %v753_v34, %v593_v33  ;;  %v598_v42 = vor.u32 %v751_v35, %v595_v36  ;;  %v602_v43 = vor.u32 %v754_v38, %v601_v37  ;;  %v609_v45 = vld [vmem:[%s1140_s0 + $0x20] sm:$0xf] }
  0x1a   :  { %381 = vmatpush.bf16.msra.mxu2 %v777_v23  ;;  %v606_v44 = vor.u32 %v752_v39, %v603_v40  ;;  %v757_v46 = vld [vmem:[%s1140_s0 + $0x2c] sm:$0xf0]  ;;  %v755_v47 = vld [vmem:[%s1140_s0 + $0x24] sm:$0xf]  ;;  %v611_v48 = vld [vmem:[%s1140_s0 + $0x30] sm:$0xf0] }
  0x1b   :  { %400 = vmatpush.bf16.msra.mxu3 %v785_v24  ;;  %v617_v49 = vld [vmem:[%s1140_s0 + $0x28] sm:$0xf]  ;;  %v758_v50 = vld [vmem:[%s1140_s0 + $0x34] sm:$0xf0]  ;;  %v756_v51 = vld [vmem:[%s1140_s0 + $0x2c] sm:$0xf]  ;;  %v610_v53 = vor.u32 %v757_v46, %v609_v45  ;;  %v614_v54 = vor.u32 %v755_v47, %v611_v48 }
  0x1c   :  { %344 = vmatpush.bf16.msra.mxu0 %v760_v25  ;;  %v619_v52 = vld [vmem:[%s1140_s0 + $0x38] sm:$0xf0]  ;;  %v618_v55 = vor.u32 %v758_v50, %v617_v49  ;;  %v796_v63 = vld [vmem:[%s1142_s2] ss:$0 sm:$0xff]  ;;  %s564_s23 = sshll.u32 %s881_s6, 4  ;;  %s565_s23 = int_to_ptr.vmem [resolvable:$true] %s564_s23 }
  0x1d   :  { %363 = vmatpush.bf16.msra.mxu1 %v768_v26  ;;  %v622_v56 = vor.u32 %v756_v51, %v619_v52 }
  0x1e   :  { %382 = vmatpush.bf16.msra.mxu2 %v776_v27 }
  0x1f   :  { %401 = vmatpush.bf16.msra.mxu3 %v784_v28 }
  0x20   :  { %345 = vmatpush.bf16.msra.mxu0 %v759_v29 }
  0x21   :  { %364 = vmatpush.bf16.msra.mxu1 %v767_v30 }
  0x22   :  { %383 = vmatpush.bf16.msra.mxu2 %v775_v31 }
  0x23   :  { %402 = vmatpush.bf16.msra.mxu3 %v783_v32  ;;  %346 = vmatmul.bf16.vlgmr.msra.gmra.mxu0 %v594_v41 }
  0x24   :  { %365 = vmatmul.bf16.vlgmr.msra.gmra.mxu1 %v598_v42 }
  0x25   :  { %384 = vmatmul.bf16.vlgmr.msra.gmra.mxu2 %v602_v43 }
  0x26   :  { %403 = vmatmul.bf16.vlgmr.msra.gmra.mxu3 %v606_v44 }
  0x33   :  { %351 = vmatmul.bf16.gmra.mxu0 %v610_v53 }
  0x34   :  { %370 = vmatmul.bf16.gmra.mxu1 %v614_v54 }
  0x35   :  { %389 = vmatmul.bf16.gmra.mxu2 %v618_v55 }
  0x36   :  { %408 = vmatmul.bf16.gmra.mxu3 %v622_v56 }
  0xa0   :  { %v347_v57 = vpop.f32.mrf.mxu0 }
  0xa1   :  { %v366_v58 = vpop.f32.mrf.mxu1 }
  0xa2   :  { %v367_v59 = vadd.f32 %v366_v58, %v347_v57 }
  0xa8   :  { %v385_v60 = vpop.f32.mrf.mxu2  ;;  %v349_v0 = vpop.f32.mrf.mxu0 }
  0xa9   :  { %v404_v61 = vpop.f32.mrf.mxu3  ;;  %v386_v62 = vadd.f32 %v385_v60, %v367_v59  ;;  %v368_v1 = vpop.f32.mrf.mxu1  ;;  %v414_v59 = vld [vmem:[%s1142_s2] sm:$0x1] }
  0xaa   :  { %v369_v4 = vadd.f32 %v368_v1, %v349_v0  ;;  %v427_v60 = vld [vmem:[%s1143_s3] sm:$0x1] }
  0xab   :  { %v405_v2 = vadd.f32 %v404_v61, %v386_v62  ;;  %v428_v1 = vld [vmem:[%s1144_s4] sm:$0x1] }
  0xad   :  { %v1087_v3 = vadd.f32 %v796_v63, %v405_v2  ;;  %v439_v23 = vmul.f32 %v405_v2, %v405_v2 }
  0xaf   :  { %423 = vst.msk [vmem:[#allocation3] sm:$0xff] %vm422_vm0, %v1087_v3 }
  0xb0   :  { %v387_v5 = vpop.f32.mrf.mxu2  ;;  %v352_v8 = vpop.f32.mrf.mxu0 }
  0xb1   :  { %v406_v6 = vpop.f32.mrf.mxu3  ;;  %v388_v7 = vadd.f32 %v387_v5, %v369_v4  ;;  %v371_v9 = vpop.f32.mrf.mxu1 }
  0xb2   :  { %v372_v12 = vadd.f32 %v371_v9, %v352_v8 }
  0xb3   :  { %v407_v10 = vadd.f32 %v406_v6, %v388_v7 }
  0xb5   :  { %v1091_v11 = vadd.f32 %v796_v63, %v407_v10  ;;  %v440_v20 = vmul.f32 %v407_v10, %v407_v10  ;;  %v429_v24 = vadd.f32 %v407_v10, %v405_v2 }
  0xb7   :  { %424 = vst.msk [vmem:[#allocation3 + $0x8] sm:$0xff] %vm422_vm0, %v1091_v11  ;;  %v443_v28 = vadd.f32 %v440_v20, %v439_v23 }
  0xb8   :  { %v390_v13 = vpop.f32.mrf.mxu2  ;;  %v354_v17 = vpop.f32.mrf.mxu0 }
  0xb9   :  { %v409_v14 = vpop.f32.mrf.mxu3  ;;  %v391_v15 = vadd.f32 %v390_v13, %v372_v12  ;;  %v373_v18 = vpop.f32.mrf.mxu1 }
  0xba   :  { %v374_v21 = vadd.f32 %v373_v18, %v354_v17 }
  0xbb   :  { %v410_v16 = vadd.f32 %v409_v14, %v391_v15 }
  0xbd   :  { %v420_v19 = vadd.f32 %v796_v63, %v410_v16  ;;  %v441_v25 = vmul.f32 %v410_v16, %v410_v16  ;;  %v430_v29 = vadd.f32 %v429_v24, %v410_v16  ;;  %v797_v16 = vld [vmem:[%s1145_s5] ss:$0 sm:$0xff] }
  0xbf   :  { %425 = vst.msk [vmem:[#allocation3 + $0x10] sm:$0xff] %vm422_vm0, %v420_v19  ;;  %v444_v31 = vadd.f32 %v443_v28, %v441_v25 }
  0xc0   :  { %v392_v22 = vpop.f32.mrf.mxu2 }
  0xc1   :  { %v393_v26 = vadd.f32 %v392_v22, %v374_v21  ;;  %v411_v27 = vpop.f32.mrf.mxu3 }
  0xc3   :  { %v412_v30 = vadd.f32 %v411_v27, %v393_v26  ;;  %v798_v27 = vld [vmem:[#allocation2] ss:$0 sm:$0xff] }
  0xc5   :  { %v421_v32 = vadd.f32 %v796_v63, %v412_v30  ;;  %v431_v33 = vadd.f32 %v430_v29, %v412_v30  ;;  %v442_v34 = vmul.f32 %v412_v30, %v412_v30 }
  0xc7   :  { %426 = vst.msk [vmem:[#allocation3 + $0x18] sm:$0xff] %vm422_vm0, %v421_v32  ;;  %v432_v35 = vrot.slane %v431_v33, 4  ;;  %v445_v36 = vadd.f32 %v444_v31, %v442_v34 }
  0xc8   :  { %546 = dma.vmem_to_hbm [thread:$0]  %s539_s17, 512, %s541_s20, [#allocation4], %s878_s14, %s878_s14, %s879_s15  }
  0xc9   :  { %v433_v37 = vadd.f32 %v432_v35, %v431_v33  ;;  %v446_v38 = vrot.slane %v445_v36, 4 }
  0xcb   :  { %v434_v39 = vrot.slane %v433_v37, 2  ;;  %v447_v40 = vadd.f32 %v446_v38, %v445_v36 }
  0xcd   :  { %v435_v41 = vadd.f32 %v434_v39, %v433_v37  ;;  %v448_v42 = vrot.slane %v447_v40, 2 }
  0xcf   :  { %v436_v43 = vrot.slane %v435_v41, 1  ;;  %v449_v44 = vadd.f32 %v448_v42, %v447_v40 }
  0xd1   :  { %v437_v45 = vadd.f32 %v436_v43, %v435_v41  ;;  %v450_v46 = vrot.slane %v449_v44, 1 }
  0xd3   :  { %v438_v47 = vmul.f32 0.03125, %v437_v45  ;;  %v451_v48 = vadd.f32 %v450_v46, %v449_v44 }
  0xd5   :  { %v452_v49 = vmul.f32 0.03125, %v451_v48  ;;  %v454_v50 = vmul.f32 %v438_v47, %v438_v47  ;;  %v453_v63 = vadd.f32 %v438_v47, %v414_v59 }
  0xd7   :  { %v455_v51 = vsub.f32 %v452_v49, %v454_v50 }
  0xd9   :  { %v456_v52 = vmax.f32 %v455_v51, 0.0 }
  0xdb   :  { %v457_v53 = vadd.f32 1e-05, %v456_v52 }
  0xdd   :  { %799 = vrsqrt.f32 %v457_v53  ;;  %vm464_vm2 = vweird.f32 %v457_v53 }
  0xe3   :  { %v800_v54 = vpop.eup %799 }
  0xe4   :  { %v459_v55 = vmul.f32 %v800_v54, %v457_v53  ;;  %vm465_vm1 = vweird.f32 %v800_v54 }
  0xe5   :  { %vm466_vm3 = vmor %vm464_vm2, %vm465_vm1 }
  0xe6   :  { %v460_v56 = vmul.f32 %v800_v54, %v459_v55 }
  0xe8   :  { %v461_v57 = vmul.f32 0.5, %v460_v56 }
  0xea   :  { %v462_v58 = vsub.f32 1.5, %v461_v57 }
  0xec   :  { %v463_v61 = vmul.f32 %v800_v54, %v462_v58 }
  0xee   :  { %v467_v62 = vsel %vm466_vm3, %v800_v54, %v463_v61 }
  0xef   :  { %v468_v0 = vmul.f32 %v467_v62, %v427_v60 }
  0xf1   :  { %v469_v2 = vmul.f32 %v468_v0, %v453_v63  ;;  %v472_v4 = vperm.slane %v468_v0, 0 }
  0xf3   :  { %v470_v5 = vsub.f32 %v428_v1, %v469_v2  ;;  %v477_v6 = vmul.f32 %v472_v4, %v421_v32  ;;  %v476_v8 = vmul.f32 %v472_v4, %v420_v19  ;;  %v474_v9 = vmul.f32 %v472_v4, %v1087_v3 }
  0xf4   :  { %v475_v10 = vmul.f32 %v472_v4, %v1091_v11 }
  0xf5   :  { %v479_v7 = vperm.slane %v470_v5, 0 }
  0xf7   :  { %v484_v12 = vadd.f32 %v479_v7, %v477_v6  ;;  %v483_v13 = vadd.f32 %v479_v7, %v476_v8  ;;  %v481_v14 = vadd.f32 %v479_v7, %v474_v9  ;;  %v482_v15 = vadd.f32 %v479_v7, %v475_v10 }
  0xf9   :  { %488 = vst.msk [vmem:[#allocation5 + $0x18] sm:$0xff] %vm422_vm0, %v484_v12  ;;  %vm491_vm4 = vcmp.ge.f32.partialorder %v483_v13, 0.0  ;;  %v495_v17 = vmul.f32 0.2, %v483_v13  ;;  %vm489_vm5 = vcmp.ge.f32.partialorder %v481_v14, 0.0  ;;  %vm492_vm6 = vcmp.ge.f32.partialorder %v484_v12, 0.0 }
  0xfa   :  { %487 = vst.msk [vmem:[#allocation5 + $0x10] sm:$0xff] %vm422_vm0, %v483_v13  ;;  %v493_v18 = vmul.f32 0.2, %v481_v14  ;;  %v496_v3 = vmul.f32 0.2, %v484_v12  ;;  %vm490_vm7 = vcmp.ge.f32.partialorder %v482_v15, 0.0 }
  0xfb   :  { %v499_v11 = vsel %vm491_vm4, %v483_v13, %v495_v17  ;;  %485 = vst.msk [vmem:[#allocation5] sm:$0xff] %vm422_vm0, %v481_v14  ;;  %v494_v19 = vmul.f32 0.2, %v482_v15 }
  0xfc   :  { %v511_v20 = vmul.f32 %v797_v16, %v499_v11  ;;  %503 = vst.msk [vmem:[#allocation7 + $0x10] sm:$0xff] %vm422_vm0, %v499_v11  ;;  %v497_v21 = vsel %vm489_vm5, %v481_v14, %v493_v18  ;;  %v500_v22 = vsel %vm492_vm6, %v484_v12, %v496_v3 }
  0xfd   :  { %v509_v23 = vmul.f32 %v797_v16, %v497_v21  ;;  %501 = vst.msk [vmem:[#allocation7] sm:$0xff] %vm422_vm0, %v497_v21  ;;  %v498_v24 = vsel %vm490_vm7, %v482_v15, %v494_v19  ;;  %v512_v25 = vmul.f32 %v797_v16, %v500_v22 }
  0xfe   :  { %517 = vadd.xlane.f32.xlu1 %v511_v20  ;;  %504 = vst.msk [vmem:[#allocation7 + $0x18] sm:$0xff] %vm422_vm0, %v500_v22  ;;  %v510_v26 = vmul.f32 %v797_v16, %v498_v24 }
  0xff   :  { %513 = vadd.xlane.f32.xlu0 %v509_v23  ;;  %486 = vst.msk [vmem:[#allocation5 + $0x8] sm:$0xff] %vm422_vm0, %v482_v15 }
 0x100   :  { %502 = vst.msk [vmem:[#allocation7 + $0x8] sm:$0xff] %vm422_vm0, %v498_v24  ;;  %559 = dma.vmem_to_hbm [thread:$0]  %s552_s13, 512, %s554_s11, [#allocation6], %s878_s14, %s878_s14, %s879_s15  }
 0x101   :  { %572 = dma.vmem_to_hbm [thread:$0]  %s565_s23, 512, %s567_s22, [#allocation6], %s878_s14, %s878_s14, %s879_s15  }
 0x106   :  { %519 = vadd.xlane.f32.xlu1 %v512_v25 }
 0x107   :  { %515 = vadd.xlane.f32.xlu0 %v510_v26 }
 0x171   :  { %v518_v28 = vpop.xlane.xlu1 %517 }
 0x172   :  { %v527_v29 = vadd.f32 %v798_v27, %v518_v28  ;;  %v514_v30 = vpop.xlane.xlu0 %513 }
 0x173   :  { %v525_v31 = vadd.f32 %v798_v27, %v514_v30 }
 0x174   :  { %532 = vst.msk [vmem:[%s1150_s10 + $0x10] sm:$0xff] %vm529_vm8, %v527_v29 }
 0x175   :  { %530 = vst.msk [vmem:[%s1150_s10] sm:$0xff] %vm529_vm8, %v525_v31 }
 0x179   :  { %v520_v32 = vpop.xlane.xlu1 %519 }
 0x17a   :  { %v528_v33 = vadd.f32 %v798_v27, %v520_v32  ;;  %v516_v34 = vpop.xlane.xlu0 %515 }
 0x17b   :  { %v526_v35 = vadd.f32 %v798_v27, %v516_v34 }
 0x17c   :  { %533 = vst.msk [vmem:[%s1150_s10 + $0x18] sm:$0xff] %vm529_vm8, %v528_v33 }
 0x17d   :  { %531 = vst.msk [vmem:[%s1150_s10 + $0x8] sm:$0xff] %vm529_vm8, %v526_v35 }
 0x17e   :  { %873 = dma.done.wait [#allocation4], 512  }
 0x17f   :  { %874 = vsyncadd [#allocation4], 4294966784 }
 0x180   :  { %875 = dma.done.wait [#allocation6], 1024  }
 0x181   :  { %876 = vsyncadd [#allocation6], 4294966272 }
 0x182   :  { %589 = vsyncpa [#allocation4], 1 }
 0x183   :  { %590 = vsyncpa [#allocation6], 1 }

</bundles_post_ra>
